<compile_context>
chip_gen: v6e
topology: v6e:2x2x1
jax: 0.10.0
libtpu: 0.0.40
codegen_flags: <defaults>
</compile_context>

<pallas_src>
import functools
from typing import NamedTuple

import jax
import jax.numpy as jnp
import numpy as np
from jax.experimental import pallas as pl
from jax.experimental.pallas import tpu as pltpu


def _round_up(x, m):
    return (x + m - 1) // m * m


def _pick_lane_tile(n):
    for c in (512, 256, 128):
        if n % c == 0:
            return c
    return n


class Dims(NamedTuple):
    R: int       # encoder.max_role_count
    F: int       # raw feature dim (pooled channels + verb emb + bias column)
    H: int       # hidden rep dim per role
    L: int       # number of role labels
    F_pad: int   # F rounded up to 32 (bf16 K-axis sublane packing)
    KP: int      # R*F_pad rounded up to 256 (256-wide MXU K for projection)
    HP: int      # H rounded up to 128 (per-role lane tile)
    L_pad: int   # L rounded up to 128 (lane-dense output)
    TL: int      # classifier lane tile (grid over L)


def make_dims(R, F, H, L):
    F_pad = _round_up(F, 32)
    KP = _round_up(R * F_pad, 256)
    HP = _round_up(H, 128)
    L_pad = _round_up(L, 128)
    TL = _pick_lane_tile(L_pad)
    return Dims(R, F, H, L, F_pad, KP, HP, L_pad, TL)


def pack_params(params, dims):
    """One-time weight packing — hoisted out of the per-call forward jit."""
    R, F, H, L = dims.R, dims.F, dims.H, dims.L
    F_pad, KP, HP, L_pad = dims.F_pad, dims.KP, dims.HP, dims.L_pad

    def _proj(w):  # (R, F, H) -> role-blocked (KP, HP), roles on sublane blocks
        w = jnp.pad(w, ((0, 0), (0, F_pad - F), (0, HP - H)))
        w = w.reshape(R * F_pad, HP)
        return jnp.pad(w, ((0, KP - R * F_pad), (0, 0)))

    # fused baseline|qctx projection weight: one MXU pass, split at lane HP
    wproj = jnp.concatenate([_proj(params["wb"]), _proj(params["wq"])],
                            axis=1).astype(jnp.bfloat16)                 # (KP, 2*HP)
    wc = jnp.pad(params["wc"], ((0, HP - H), (0, L_pad - L))).astype(jnp.bfloat16)
    bc = jnp.pad(params["bc"], (0, L_pad - L))[None, :].astype(jnp.float32)
    return {"verb_emb": params["verb_emb"], "wproj": wproj, "wc": wc, "bc": bc}


def _fused_kernel(hp, x_ref, wproj_ref, q_ref, wc_ref, bc_ref, out_ref, mix_ref):
    """Grid = (batch-row tiles, L tiles).

    x_ref    : (TB, KP)     bf16  role-blocked features, rows = (b, r)
    wproj_ref: (KP, 2*HP)   bf16  fused baseline|qctx projection weight
    q_ref    : (TB, 1)      f32   verb_role_impact per (b, r) row
    wc_ref   : (HP, TL)     bf16  shared classifier weight tile
    bc_ref   : (1, TL)      f32   classifier bias tile
    out_ref  : (TB, TL)     f32   lane-dense logits tile
    mix_ref  : (TB, HP)     bf16  persistent scratch: mixed rep per batch tile
    """
    @pl.when(pl.program_id(1) == 0)
    def _():
        proj = jnp.dot(x_ref[...], wproj_ref[...],
                       preferred_element_type=jnp.float32)       # (TB, 2*HP)
        base = proj[:, :hp]
        qctx = proj[:, hp:]
        q = q_ref[...]                                           # (TB, 1) broadcast
        # final_rep = q*qctx + (1-q)*base == base + q*(qctx - base)
        mix_ref[...] = (base + q * (qctx - base)).astype(mix_ref.dtype)

    logits = jnp.dot(mix_ref[...], wc_ref[...],
                     preferred_element_type=jnp.float32)          # (TB, TL)
    out_ref[...] = logits + bc_ref[...]


@functools.partial(jax.jit, static_argnums=(4,))
def top_down_baseline_forward(v_org, gt_verb, verb_role_impact, packed, dims):
    """Pallas forward.  Returns role_label_pred of shape (B, R, L)."""
    R, F, L = dims.R, dims.F, dims.L
    F_pad, KP, HP, L_pad, TL = dims.F_pad, dims.KP, dims.HP, dims.L_pad, dims.TL
    B = v_org.shape[0]
    BR = B * R
    if BR <= 128:
        TB = _round_up(BR, 8)
        BR_pad = TB
    else:
        TB = 128
        BR_pad = _round_up(BR, TB)

    # ---- per-call feature construction: pooled image + verb embedding + bias 1
    pooled = jnp.mean(v_org, axis=(2, 3))                                 # (B, C)
    verb_emb = packed["verb_emb"][gt_verb]                                # (B, E)
    feat = jnp.concatenate(
        [pooled, verb_emb, jnp.ones((B, 1), v_org.dtype)], axis=1)        # (B, F)

    # roles on sublanes: row (b*R + r) carries feat[b] in cols [r*F_pad, r*F_pad+F)
    eye_r = jnp.eye(R, dtype=feat.dtype)
    x = jnp.einsum("bf,rs->brsf", feat, eye_r)                            # (B,R,R,F)
    x = jnp.pad(x, ((0, 0), (0, 0), (0, 0), (0, F_pad - F)))
    x = x.reshape(BR, R * F_pad)
    x = jnp.pad(x, ((0, BR_pad - BR), (0, KP - R * F_pad))).astype(jnp.bfloat16)

    # mixing weights as a (BR_pad, 1) column, broadcast along lanes in-kernel
    q = verb_role_impact.astype(jnp.float32).reshape(BR, 1)
    q = jnp.pad(q, ((0, BR_pad - BR), (0, 0)))

    nb, nl = BR_pad // TB, L_pad // TL

    # VMEM budget: double-buffered tiles + persistent scratch (+4x headroom)
    tile_bytes = (TB * KP * 2 + KP * 2 * HP * 2 + TB * 4
                  + HP * TL * 2 + TL * 4 + TB * TL * 4)
    vmem_limit = int(min(64 << 20, max(4 * (2 * tile_bytes + TB * HP * 2), 8 << 20)))

    cost = pl.CostEstimate(
        flops=2 * BR_pad * KP * (2 * HP) + 2 * BR_pad * HP * L_pad,
        transcendentals=0,
        bytes_accessed=(BR_pad * KP * 2 + KP * 2 * HP * 2 + BR_pad * 4
                        + HP * L_pad * 2 + L_pad * 4 + BR_pad * L_pad * 4),
    )

    out = pl.pallas_call(
        functools.partial(_fused_kernel, HP),
        out_shape=jax.ShapeDtypeStruct((BR_pad, L_pad), jnp.float32),
        grid_spec=pltpu.PrefetchScalarGridSpec(
            num_scalar_prefetch=0,
            grid=(nb, nl),
            in_specs=[
                pl.BlockSpec((TB, KP), lambda b, l: (b, 0)),       # x
                pl.BlockSpec((KP, 2 * HP), lambda b, l: (0, 0)),   # wproj (resident)
                pl.BlockSpec((TB, 1), lambda b, l: (b, 0)),        # q
                pl.BlockSpec((HP, TL), lambda b, l: (0, l)),       # wc tile
                pl.BlockSpec((1, TL), lambda b, l: (0, l)),        # bc tile
            ],
            out_specs=pl.BlockSpec((TB, TL), lambda b, l: (b, l)),
            scratch_shapes=[pltpu.VMEM((TB, HP), jnp.bfloat16)],
        ),
        compiler_params=pltpu.CompilerParams(
            dimension_semantics=("parallel", "arbitrary"),
            vmem_limit_bytes=vmem_limit,
        ),
        cost_estimate=cost,
    )(x, packed["wproj"], q, packed["wc"], packed["bc"])

    # rows are (b, r)-ordered; un-pad and view as (B, R, L) — no transpose needed
    return out[:BR, :L].reshape(B, R, L)


def reference_forward(v_org, gt_verb, verb_role_impact, params):
    """Pure-JAX f32 reference replicating the PyTorch forward semantics."""
    B = v_org.shape[0]
    pooled = jnp.mean(v_org, axis=(2, 3))
    verb_emb = params["verb_emb"][gt_verb]
    feat = jnp.concatenate([pooled, verb_emb, jnp.ones((B, 1), v_org.dtype)], axis=1)

    base = jnp.einsum("bf,rfh->brh", feat, params["wb"])   # baseline_out (B, R, H)
    qctx = jnp.einsum("bf,rfh->brh", feat, params["wq"])   # qctx_out     (B, R, H)
    q = verb_role_impact[:, :, None]                       # (B, R, 1)
    mix = q * qctx + (1.0 - q) * base                      # final_rep
    logits = jnp.einsum("brh,hl->brl", mix, params["wc"]) + params["bc"]
    return logits                                          # role_label_pred (B, R, L)


def init_params(key, *, C, E, R, H, L, num_verbs):
    F_dim = C + E + 1  # pooled image channels + verb embedding + bias column
    k = jax.random.split(key, 5)
    return {
        "verb_emb": jax.random.normal(k[0], (num_verbs, E), jnp.float32) * 0.5,
        "wb": jax.random.normal(k[1], (R, F_dim, H), jnp.float32) / np.sqrt(F_dim),
        "wq": jax.random.normal(k[2], (R, F_dim, H), jnp.float32) / np.sqrt(F_dim),
        "wc": jax.random.normal(k[3], (H, L), jnp.float32) / np.sqrt(H),
        "bc": jax.random.normal(k[4], (L,), jnp.float32) * 0.01,
    }


if __name__ == "__main__":
    # Small shapes consistent with the module's forward:
    #   v_org: (B, C, H, W) image tensor, gt_verb: (B,) verb ids,
    #   verb_role_impact: (B, max_role_count) mixing weights in [0, 1].
    B, C, Himg, Wimg = 2, 4, 16, 16
    R = 6          # encoder.max_role_count
    E = 16         # verb embedding dim
    H = 32         # hidden rep dim per role
    L = 128        # number of role labels (classifier output)
    num_verbs = 10

    key = jax.random.PRNGKey(0)
    k_v, k_verb, k_imp, k_p = jax.random.split(key, 4)

    v_org = jax.random.normal(k_v, (B, C, Himg, Wimg), jnp.float32)
    gt_verb = jax.random.randint(k_verb, (B,), 0, num_verbs)
    verb_role_impact = jax.random.uniform(k_imp, (B, R), jnp.float32)

    params = init_params(k_p, C=C, E=E, R=R, H=H, L=L, num_verbs=num_verbs)

    dims = make_dims(R, C + E + 1, H, L)
    packed = pack_params(params, dims)   # one-time weight packing (outside forward)

    role_label_pred = top_down_baseline_forward(
        v_org, gt_verb, verb_role_impact, packed, dims)
    role_label_pred = jax.block_until_ready(role_label_pred)

    ref = jax.block_until_ready(
        reference_forward(v_org, gt_verb, verb_role_impact, params))

    assert role_label_pred.shape == (B, R, L), role_label_pred.shape
    # bf16 MXU inputs with f32 accumulation vs an all-f32 reference
    np.testing.assert_allclose(np.asarray(role_label_pred), np.asarray(ref),
                               rtol=2e-2, atol=3e-2)
    print("KERNEL_OK")
</pallas_src>

<mosaic_0001>
module attributes {stable_mosaic.version = 11 : i64} {
  func.func @_fused_kernel(%arg0: i32, %arg1: i32, %arg2: memref<16x256xbf16, #tpu.memory_space<vmem>>, %arg3: memref<256x256xbf16, #tpu.memory_space<vmem>>, %arg4: memref<16x1xf32, #tpu.memory_space<vmem>>, %arg5: memref<128x128xbf16, #tpu.memory_space<vmem>>, %arg6: memref<1x128xf32, #tpu.memory_space<vmem>>, %arg7: memref<16x128xf32, #tpu.memory_space<vmem>>, %arg8: memref<16x128xbf16, #tpu.memory_space<vmem>>) attributes {dimension_semantics = [#tpu.dimension_semantics<parallel>, #tpu.dimension_semantics<arbitrary>], iteration_bounds = array<i64: 1, 1>, scalar_prefetch = 0 : i64, scratch_operands = 1 : i64, tpu.core_type = #tpu.core_type<tc>, window_params = [{transform_indices = @transform_0, window_bounds = array<i64: 16, 256>}, {pipeline_mode = #tpu.pipeline_mode<synchronous>, transform_indices = @transform_1, window_bounds = array<i64: 256, 256>}, {transform_indices = @transform_2, window_bounds = array<i64: 16, 1>}, {transform_indices = @transform_3, window_bounds = array<i64: 128, 128>}, {transform_indices = @transform_4, window_bounds = array<i64: 1, 128>}, {transform_indices = @transform_5, window_bounds = array<i64: 16, 128>}]} {
    %c0_i32 = arith.constant 0 : i32
    %0 = arith.cmpi eq, %arg1, %c0_i32 : i32
    %1 = arith.extui %0 : i1 to i32
    %c0_i32_0 = arith.constant 0 : i32
    %2 = arith.cmpi ne, %1, %c0_i32_0 : i32
    scf.if %2 {
      %c0_8 = arith.constant 0 : index
      %c0_9 = arith.constant 0 : index
      %10 = vector.load %arg2[%c0_8, %c0_9] : memref<16x256xbf16, #tpu.memory_space<vmem>>, vector<16x256xbf16>
      %c0_10 = arith.constant 0 : index
      %c0_11 = arith.constant 0 : index
      %11 = vector.load %arg3[%c0_10, %c0_11] : memref<256x256xbf16, #tpu.memory_space<vmem>>, vector<256x256xbf16>
      %cst_12 = arith.constant dense<0.000000e+00> : vector<16x256xf32>
      %12 = tpu.matmul %10, %11, %cst_12 {dimension_numbers = #tpu.dot_dimension_numbers<[1], [0], [0], [1], [0, 0, 1, 1], [], []>} : vector<16x256xbf16>, vector<256x256xbf16>, vector<16x256xf32> -> vector<16x256xf32>
      %13 = vector.extract_strided_slice %12 {offsets = [0, 0], sizes = [16, 128], strides = [1, 1]} : vector<16x256xf32> to vector<16x128xf32>
      %14 = vector.extract_strided_slice %12 {offsets = [0, 128], sizes = [16, 128], strides = [1, 1]} : vector<16x256xf32> to vector<16x128xf32>
      %c0_13 = arith.constant 0 : index
      %c0_14 = arith.constant 0 : index
      %15 = vector.load %arg4[%c0_13, %c0_14] : memref<16x1xf32, #tpu.memory_space<vmem>>, vector<16x1xf32>
      %16 = arith.subf %14, %13 : vector<16x128xf32>
      %17 = vector.broadcast %15 : vector<16x1xf32> to vector<16x128xf32>
      %18 = arith.mulf %17, %16 : vector<16x128xf32>
      %19 = arith.addf %13, %18 : vector<16x128xf32>
      %20 = arith.truncf %19 : vector<16x128xf32> to vector<16x128xbf16>
      %c0_15 = arith.constant 0 : index
      %c0_16 = arith.constant 0 : index
      %21 = vector.load %arg8[%c0_15, %c0_16] : memref<16x128xbf16, #tpu.memory_space<vmem>>, vector<16x128xbf16>
      tpu.vector_store %arg8[%c0_15, %c0_16], %20 {strides = array<i32>} : memref<16x128xbf16, #tpu.memory_space<vmem>>, vector<16x128xbf16>,
    } else {
    }
    %c0 = arith.constant 0 : index
    %c0_1 = arith.constant 0 : index
    %3 = vector.load %arg8[%c0, %c0_1] : memref<16x128xbf16, #tpu.memory_space<vmem>>, vector<16x128xbf16>
    %c0_2 = arith.constant 0 : index
    %c0_3 = arith.constant 0 : index
    %4 = vector.load %arg5[%c0_2, %c0_3] : memref<128x128xbf16, #tpu.memory_space<vmem>>, vector<128x128xbf16>
    %cst = arith.constant dense<0.000000e+00> : vector<16x128xf32>
    %5 = tpu.matmul %3, %4, %cst {dimension_numbers = #tpu.dot_dimension_numbers<[1], [0], [0], [1], [0, 0, 1, 1], [], []>} : vector<16x128xbf16>, vector<128x128xbf16>, vector<16x128xf32> -> vector<16x128xf32>
    %c0_4 = arith.constant 0 : index
    %c0_5 = arith.constant 0 : index
    %6 = vector.load %arg6[%c0_4, %c0_5] : memref<1x128xf32, #tpu.memory_space<vmem>>, vector<1x128xf32>
    %7 = vector.broadcast %6 : vector<1x128xf32> to vector<16x128xf32>
    %8 = arith.addf %5, %7 : vector<16x128xf32>
    %c0_6 = arith.constant 0 : index
    %c0_7 = arith.constant 0 : index
    %9 = vector.load %arg7[%c0_6, %c0_7] : memref<16x128xf32, #tpu.memory_space<vmem>>, vector<16x128xf32>
    tpu.vector_store %arg7[%c0_6, %c0_7], %8 {strides = array<i32>} : memref<16x128xf32, #tpu.memory_space<vmem>>, vector<16x128xf32>,
    return
  }
  func.func @transform_0(%arg0: i32, %arg1: i32) -> (i32, i32) {
    %c0_i32 = arith.constant 0 : i32
    %c0_i32_0 = arith.constant 0 : i32
    return %arg0, %c0_i32 : i32, i32
  }
  func.func @transform_1(%arg0: i32, %arg1: i32) -> (i32, i32) {
    %c0_i32 = arith.constant 0 : i32
    %c0_i32_0 = arith.constant 0 : i32
    %c0_i32_1 = arith.constant 0 : i32
    return %c0_i32, %c0_i32_0 : i32, i32
  }
  func.func @transform_2(%arg0: i32, %arg1: i32) -> (i32, i32) {
    %c0_i32 = arith.constant 0 : i32
    %c0_i32_0 = arith.constant 0 : i32
    return %arg0, %c0_i32 : i32, i32
  }
  func.func @transform_3(%arg0: i32, %arg1: i32) -> (i32, i32) {
    %c0_i32 = arith.constant 0 : i32
    %c0_i32_0 = arith.constant 0 : i32
    return %c0_i32, %arg1 : i32, i32
  }
  func.func @transform_4(%arg0: i32, %arg1: i32) -> (i32, i32) {
    %c0_i32 = arith.constant 0 : i32
    %c0_i32_0 = arith.constant 0 : i32
    return %c0_i32, %arg1 : i32, i32
  }
  func.func @transform_5(%arg0: i32, %arg1: i32) -> (i32, i32) {
    %c0_i32 = arith.constant 0 : i32
    return %arg0, %arg1 : i32, i32
  }
}

</mosaic_0001>

<bundles_post_ra>
// kernel: top_down_baseline_forward.1
= control target key start
LH: loop header
LB: loop body
LE: loop exit
PB: predicated region body
PF: predicated region fallthrough
CT: control target
= control target key end

     0   :  { %v572_v1 = vmov 0   ;;  %v573_v2 = vmov 0.0   ;;  %vm574_vm0 = vmmov 0   ;;  %s755_s1 = inlined_call_operand.vmem [shape: bf16[256,256], index: 1, kind: input, shape index: {}]   ;;  %s756_s0 = inlined_call_operand.vmem [shape: bf16[16,256], index: 0, kind: input, shape index: {}]   ;;  %s757_s2 = inlined_call_operand.vmem [shape: f32[16,1], index: 2, kind: input, shape index: {}]   ;;  %s758_s3 = inlined_call_operand.vmem [shape: bf16[128,128], index: 3, kind: input, shape index: {}]   ;;  %s759_s4 = inlined_call_operand.vmem [shape: f32[1,128], index: 4, kind: input, shape index: {}]   ;;  %s760_s5 = inlined_call_operand.vmem [shape: f32[16,128], index: 5, kind: output, shape index: {}]  }
   0x1   :  { %v512_v0 = vld [vmem:[%s755_s1 + $0x74] ss:$8 sps:$4 sm:$0xff]   ;;  %511 = vset.pattern.permute.xlu0 %v572_v1  ;;  %488 = vmatprep.subr.bf16.mxu1 %v573_v2  ;;  %v514_v3 = vld [vmem:[%s755_s1 + $0x70] ss:$8 sps:$4 sm:$0xff]   ;;  %v515_v4 = vld [vmem:[%s755_s1 + $0x64] ss:$8 sps:$4 sm:$0xff]  }
   0x2   :  { %229 = vmatprep.subr.bf16.mxu0 %v512_v0  ;;  %v517_v5 = vld [vmem:[%s755_s1 + $0x60] ss:$8 sps:$4 sm:$0xff]   ;;  %v518_v6 = vld [vmem:[%s755_s1 + $0x54] ss:$8 sps:$4 sm:$0xff]   ;;  %v520_v7 = vld [vmem:[%s755_s1 + $0x50] ss:$8 sps:$4 sm:$0xff]   ;;  %504 = vmatprep.mubr.msk.bf16.mxu1 %vm574_vm0, %v573_v2 }
   0x3   :  { %230 = vmatpush1.bf16.msra.mxu0 %v514_v3  ;;  %v521_v8 = vld [vmem:[%s755_s1 + $0x44] ss:$8 sps:$4 sm:$0xff]   ;;  %v523_v9 = vld [vmem:[%s755_s1 + $0x40] ss:$8 sps:$4 sm:$0xff]   ;;  %v524_v10 = vld [vmem:[%s755_s1 + $0x34] ss:$8 sps:$4 sm:$0xff]  }
   0x4   :  { %231 = vmatprep.subr.bf16.mxu0 %v515_v4  ;;  %v526_v11 = vld [vmem:[%s755_s1 + $0x30] ss:$8 sps:$4 sm:$0xff]   ;;  %v527_v12 = vld [vmem:[%s755_s1 + $0x24] ss:$8 sps:$4 sm:$0xff]   ;;  %v529_v13 = vld [vmem:[%s755_s1 + $0x20] ss:$8 sps:$4 sm:$0xff]  }
   0x5   :  { %v530_v14 = vld [vmem:[%s755_s1 + $0x14] ss:$8 sps:$4 sm:$0xff]   ;;  %v532_v15 = vld [vmem:[%s755_s1 + $0x10] ss:$8 sps:$4 sm:$0xff]   ;;  %v533_v16 = vld [vmem:[%s755_s1 + $0x4] ss:$8 sps:$4 sm:$0xff]  }
   0x6   :  { %v562_v17 = vld [vmem:[%s756_s0 + $0x4] ss:$8 sps:$4 sm:$0xff]   ;;  %v563_v20 = vld [vmem:[%s758_s3 + $0x38] sm:$0xff]   ;;  %v535_v21 = vld [vmem:[%s755_s1] ss:$8 sps:$4 sm:$0xff]  }
   0x7   :  { %232 = vmatpush1.bf16.msra.mxu0 %v517_v5  ;;  %v272_v18 = vld [vmem:[%s757_s2] sm:$0xff]  ;;  %v273_v19 = vld [vmem:[%s757_s2 + $0x8] sm:$0xff]  ;;  %261 = vmatprep.mubr.bf16.mxu0 %v562_v17  ;;  %v564_v22 = vld [vmem:[%s758_s3 + $0x30] sm:$0xff]  }
   0x8   :  { %233 = vmatprep.subr.bf16.mxu0 %v518_v6  ;;  %278 = vperm.xlu0 %511, %v272_v18   ;;  %v536_v23 = vld [vmem:[%s755_s1 + $0xf4] ss:$8 sps:$4 sm:$0xff]   ;;  %v538_v24 = vld [vmem:[%s755_s1 + $0xf0] ss:$8 sps:$4 sm:$0xff]   ;;  %v539_v25 = vld [vmem:[%s755_s1 + $0xe4] ss:$8 sps:$4 sm:$0xff]  }
   0x9   :  { %489 = vmatpush3.bf16.msra.mxu1 %v563_v20  ;;  %v541_v26 = vld [vmem:[%s755_s1 + $0xe0] ss:$8 sps:$4 sm:$0xff]   ;;  %v542_v27 = vld [vmem:[%s755_s1 + $0xd4] ss:$8 sps:$4 sm:$0xff]   ;;  %v544_v28 = vld [vmem:[%s755_s1 + $0xd0] ss:$8 sps:$4 sm:$0xff]  }
   0xa   :  { %490 = vmatprep.subr.bf16.mxu1 %v573_v2  ;;  %v545_v29 = vld [vmem:[%s755_s1 + $0xc4] ss:$8 sps:$4 sm:$0xff]   ;;  %v547_v30 = vld [vmem:[%s755_s1 + $0xc0] ss:$8 sps:$4 sm:$0xff]   ;;  %v548_v31 = vld [vmem:[%s755_s1 + $0xb4] ss:$8 sps:$4 sm:$0xff]  }
   0xb   :  { %234 = vmatpush1.bf16.msra.mxu0 %v520_v7  ;;  %v550_v32 = vld [vmem:[%s755_s1 + $0xb0] ss:$8 sps:$4 sm:$0xff]   ;;  %v551_v33 = vld [vmem:[%s755_s1 + $0xa4] ss:$8 sps:$4 sm:$0xff]   ;;  %v553_v34 = vld [vmem:[%s755_s1 + $0xa0] ss:$8 sps:$4 sm:$0xff]  }
   0xc   :  { %235 = vmatprep.subr.bf16.mxu0 %v521_v8  ;;  %283 = vperm.xlu0 %511, %v273_v19   ;;  %v554_v35 = vld [vmem:[%s755_s1 + $0x94] ss:$8 sps:$4 sm:$0xff]   ;;  %v556_v36 = vld [vmem:[%s755_s1 + $0x90] ss:$8 sps:$4 sm:$0xff]   ;;  %v557_v37 = vld [vmem:[%s755_s1 + $0x84] ss:$8 sps:$4 sm:$0xff]  }
   0xd   :  { %491 = vmatpush3.bf16.msra.mxu1 %v564_v22  ;;  %v559_v38 = vld [vmem:[%s755_s1 + $0x80] ss:$8 sps:$4 sm:$0xff]   ;;  %v567_v42 = vld [vmem:[%s758_s3 + $0x18] sm:$0xff]   ;;  %v568_v43 = vld [vmem:[%s758_s3 + $0x10] sm:$0xff]  }
   0xe   :  { %492 = vmatprep.subr.bf16.mxu1 %v573_v2  ;;  %v560_v39 = vld [vmem:[%s756_s0] ss:$8 sps:$4 sm:$0xff]  }
   0xf   :  { %236 = vmatpush1.bf16.msra.mxu0 %v523_v9  ;;  %v565_v40 = vld [vmem:[%s758_s3 + $0x28] sm:$0xff]   ;;  %v566_v41 = vld [vmem:[%s758_s3 + $0x20] sm:$0xff]  }
  0x10   :  { %237 = vmatprep.subr.bf16.mxu0 %v524_v10  ;;  %v569_v44 = vld [vmem:[%s758_s3 + $0x8] sm:$0xff]   ;;  %v570_v45 = vld [vmem:[%s758_s3] sm:$0xff]  }
  0x11   :  { %493 = vmatpush3.bf16.msra.mxu1 %v565_v40  ;;  %v462_v60 = vld [vmem:[%s759_s4] ss:$0 sm:$0xff] }
  0x12   :  { %494 = vmatprep.subr.bf16.mxu1 %v573_v2 }
  0x13   :  { %238 = vmatpush1.bf16.msra.mxu0 %v526_v11 }
  0x14   :  { %239 = vmatprep.subr.bf16.mxu0 %v527_v12 }
  0x15   :  { %495 = vmatpush3.bf16.msra.mxu1 %v566_v41 }
  0x16   :  { %496 = vmatprep.subr.bf16.mxu1 %v573_v2 }
  0x17   :  { %240 = vmatpush1.bf16.msra.mxu0 %v529_v13 }
  0x18   :  { %241 = vmatprep.subr.bf16.mxu0 %v530_v14 }
  0x19   :  { %497 = vmatpush3.bf16.msra.mxu1 %v567_v42 }
  0x1a   :  { %498 = vmatprep.subr.bf16.mxu1 %v573_v2 }
  0x1b   :  { %242 = vmatpush1.bf16.msra.mxu0 %v532_v15 }
  0x1c   :  { %243 = vmatprep.subr.bf16.mxu0 %v533_v16 }
  0x1d   :  { %499 = vmatpush3.bf16.msra.mxu1 %v568_v43 }
  0x1e   :  { %500 = vmatprep.subr.bf16.mxu1 %v573_v2 }
  0x1f   :  { %244 = vmatpush1.bf16.msra.mxu0 %v535_v21 }
  0x20   :  { %245 = vmatprep.subr.bf16.mxu0 %v536_v23 }
  0x21   :  { %501 = vmatpush3.bf16.msra.mxu1 %v569_v44 }
  0x22   :  { %502 = vmatprep.subr.bf16.mxu1 %v573_v2 }
  0x23   :  { %246 = vmatpush2.bf16.msra.mxu0 %v538_v24 }
  0x24   :  { %247 = vmatprep.subr.bf16.mxu0 %v539_v25 }
  0x25   :  { %503 = vmatpush3.bf16.msra.mxu1 %v570_v45 }
  0x27   :  { %248 = vmatpush2.bf16.msra.mxu0 %v541_v26 }
  0x28   :  { %249 = vmatprep.subr.bf16.mxu0 %v542_v27 }
  0x2b   :  { %250 = vmatpush2.bf16.msra.mxu0 %v544_v28 }
  0x2c   :  { %251 = vmatprep.subr.bf16.mxu0 %v545_v29 }
  0x2f   :  { %252 = vmatpush2.bf16.msra.mxu0 %v547_v30 }
  0x30   :  { %253 = vmatprep.subr.bf16.mxu0 %v548_v31 }
  0x33   :  { %254 = vmatpush2.bf16.msra.mxu0 %v550_v32 }
  0x34   :  { %255 = vmatprep.subr.bf16.mxu0 %v551_v33 }
  0x37   :  { %256 = vmatpush2.bf16.msra.mxu0 %v553_v34 }
  0x38   :  { %257 = vmatprep.subr.bf16.mxu0 %v554_v35 }
  0x3b   :  { %258 = vmatpush2.bf16.msra.mxu0 %v556_v36 }
  0x3c   :  { %259 = vmatprep.subr.bf16.mxu0 %v557_v37 }
  0x3f   :  { %260 = vmatpush2.bf16.msra.mxu0 %v559_v38 }
  0x42   :  { %262 = vmatmul.mubr.bf16.vlgmr.msra.gmra.mxu0 %v560_v39 }
  0x83   :  { %v279_v47 = vpop.permute.xlu0 %278 }
  0x87   :  { %v284_v54 = vpop.permute.xlu0 %283 }
 0x102   :  { %v263_v46 = vpop.f32.mrf.mxu0 }
 0x104   :  { %v265_v48 = vpop.f32.mrf.mxu0 }
 0x105   :  { %v274_v49 = vsub.f32 %v265_v48, %v263_v46 }
 0x106   :  { %v267_v50 = vpop.f32.mrf.mxu0 }
 0x107   :  { %v286_v52 = vmul.f32 %v279_v47, %v274_v49 }
 0x108   :  { %v269_v51 = vpop.f32.mrf.mxu0 }
 0x109   :  { %v275_v53 = vsub.f32 %v269_v51, %v267_v50  ;;  %v288_v56 = vadd.f32 %v286_v52, %v263_v46 }
 0x10b   :  { %v287_v55 = vmul.f32 %v284_v54, %v275_v53 }
 0x10d   :  { %v289_v57 = vadd.f32 %v287_v55, %v267_v50 }
 0x10f   :  { %v477_v58 = vpack.c.bf16 %v289_v57, %v288_v56 }
 0x111   :  { %478 = vst [vmem:[#allocation2] sm:$0xff] %v477_v58  }
 0x118   :  { %v571_v59 = vld [vmem:[#allocation2] sm:$0xff]  }
 0x119   :  { %505 = vmatmul.mubr.bf16.vlgmr.msra.gmra.mxu1 %v571_v59 }
 0x1d9   :  { %v413_v61 = vpop.f32.mrf.mxu1 }
 0x1da   :  { %v414_v62 = vadd.f32 %v462_v60, %v413_v61 }
 0x1db   :  { %v506_v63 = vpop.f32.mrf.mxu1 }
 0x1dc   :  { %420 = vst [vmem:[%s760_s5] sm:$0xff] %v414_v62 }
 0x1dd   :  { %v416_v0 = vpop.f32.mrf.mxu1 }
 0x1de   :  { %v417_v1 = vadd.f32 %v462_v60, %v416_v0 }
 0x1df   :  { %v507_v2 = vpop.f32.mrf.mxu1 }
 0x1e0   :  { %421 = vst [vmem:[%s760_s5 + $0x8] sm:$0xff] %v417_v1 }

</bundles_post_ra>
